<compile_context>
chip_gen: v7x
topology: tpu7x:2x2x1
jax: 0.10.0
libtpu: 0.0.40
codegen_flags: <defaults>
</compile_context>

<pallas_src>
import functools

import jax
import jax.numpy as jnp
from jax.experimental import pallas as pl
from jax.experimental.pallas import tpu as pltpu

HIDDEN = 128  # fixed by the module definition: nn.Linear(nStateDim, 128)


def _brain_kernel(x_ref, w1_ref, b1_ref, w2_ref, b2_ref, out_ref):
    # Two MXU matmuls with f32 accumulation + VPU bias add / ReLU.
    x = x_ref[...]                                                      # (TB, K) f32
    h = jnp.dot(x, w1_ref[...], preferred_element_type=jnp.float32)    # (TB, 128) f32
    h = jnp.maximum(h + b1_ref[...], 0.0)                              # bias + ReLU
    y = jnp.dot(h, w2_ref[...], preferred_element_type=jnp.float32)    # (TB, N) f32
    out_ref[...] = (y + b2_ref[...]).astype(out_ref.dtype)


def _round_up(n, m):
    return ((n + m - 1) // m) * m


@functools.partial(jax.jit, static_argnames=("block_b",))
def brain_forward(x, w1, b1, w2, b2, *, block_b=4096):
    """Equivalent of Brain.forward.

    x:  (B, nStateDim) or (nStateDim,)
    w1: (nStateDim, 128), b1: (128,)
    w2: (128, nActions),  b2: (nActions,)
    returns: (B, nActions) float32
    """
    if x.ndim == 1:
        x = x[None, :]          # mirror torch's unsqueeze(0)
    x = x.astype(jnp.float32)   # no-op for f32 inputs; no padding pass over x

    B, K = x.shape
    hidden = w1.shape[1]
    n_actions = w2.shape[1]

    # Batch tile: big tiles for large B (amortize per-step overhead), and a
    # sublane-aligned single tile for small B.  The last grid step may overhang
    # B; Pallas masks the out-of-bounds writes.
    TB = min(block_b, _round_up(B, 8))
    grid = (pl.cdiv(B, TB),)

    # Tiny resident operands (one-time casts/reshapes; weights never re-DMA'd).
    w1_f = w1.astype(jnp.float32)
    w2_f = w2.astype(jnp.float32)
    b1_2d = b1.reshape(1, hidden).astype(jnp.float32)
    b2_2d = b2.reshape(1, n_actions).astype(jnp.float32)

    out = pl.pallas_call(
        _brain_kernel,
        out_shape=jax.ShapeDtypeStruct((B, n_actions), jnp.float32),
        grid=grid,
        in_specs=[
            pl.BlockSpec((TB, K), lambda i: (i, 0)),           # x: streamed over batch
            pl.BlockSpec((K, hidden), lambda i: (0, 0)),       # w1: resident
            pl.BlockSpec((1, hidden), lambda i: (0, 0)),       # b1: resident
            pl.BlockSpec((hidden, n_actions), lambda i: (0, 0)),  # w2: resident
            pl.BlockSpec((1, n_actions), lambda i: (0, 0)),    # b2: resident
        ],
        out_specs=pl.BlockSpec((TB, n_actions), lambda i: (i, 0)),
        compiler_params=pltpu.CompilerParams(
            dimension_semantics=("parallel",),   # batch axis is embarrassingly parallel
            vmem_limit_bytes=32 * 1024 * 1024,   # safe on all generations; usage is <2 MiB
        ),
    )(x, w1_f, b1_2d, w2_f, b2_2d)

    return out


def init_brain_params(key, n_state_dim, n_actions, hidden=HIDDEN):
    """Deterministic synthetic init (uniform, PyTorch-Linear-like scaling)."""
    k1, k2, k3, k4 = jax.random.split(key, 4)
    lim1 = 1.0 / jnp.sqrt(n_state_dim)
    lim2 = 1.0 / jnp.sqrt(hidden)
    w1 = jax.random.uniform(k1, (n_state_dim, hidden), jnp.float32, -lim1, lim1)
    b1 = jax.random.uniform(k2, (hidden,), jnp.float32, -lim1, lim1)
    w2 = jax.random.uniform(k3, (hidden, n_actions), jnp.float32, -lim2, lim2)
    b2 = jax.random.uniform(k4, (n_actions,), jnp.float32, -lim2, lim2)
    return w1, b1, w2, b2


if __name__ == "__main__":
    key = jax.random.PRNGKey(0)
    k_params, k_x, k_x2 = jax.random.split(key, 3)

    n_state_dim = 32   # nStateDim
    n_actions = 8      # nActions
    batch = 4

    w1, b1, w2, b2 = init_brain_params(k_params, n_state_dim, n_actions)
    x = jax.random.normal(k_x, (batch, n_state_dim), jnp.float32)

    q_values = jax.block_until_ready(brain_forward(x, w1, b1, w2, b2))

    # Pure-JAX reference of the same forward pass.
    ref = jnp.maximum(x @ w1 + b1, 0.0) @ w2 + b2
    assert q_values.shape == (batch, n_actions)
    assert jnp.allclose(q_values, ref, atol=2e-2, rtol=2e-2), (
        float(jnp.max(jnp.abs(q_values - ref))))

    # 1-D (unsqueeze) path.
    q_single = jax.block_until_ready(brain_forward(x[0], w1, b1, w2, b2))
    assert q_single.shape == (1, n_actions)
    assert jnp.allclose(q_single, ref[0:1], atol=2e-2, rtol=2e-2)

    # Multi-step grid with a ragged last block (B=100, TB=64 -> grid=2) to
    # exercise the masked boundary handling (no batch padding in the wrapper).
    x2 = jax.random.normal(k_x2, (100, n_state_dim), jnp.float32)
    q2 = jax.block_until_ready(brain_forward(x2, w1, b1, w2, b2, block_b=64))
    ref2 = jnp.maximum(x2 @ w1 + b1, 0.0) @ w2 + b2
    assert q2.shape == (100, n_actions)
    assert jnp.allclose(q2, ref2, atol=2e-2, rtol=2e-2), (
        float(jnp.max(jnp.abs(q2 - ref2))))

    print("KERNEL_OK")
</pallas_src>

<mosaic_0001>
module attributes {stable_mosaic.version = 11 : i64} {
  func.func @_brain_kernel(%arg0: i32, %arg1: memref<8x32xf32, #tpu.memory_space<vmem>>, %arg2: memref<32x128xf32, #tpu.memory_space<vmem>>, %arg3: memref<1x128xf32, #tpu.memory_space<vmem>>, %arg4: memref<128x8xf32, #tpu.memory_space<vmem>>, %arg5: memref<1x8xf32, #tpu.memory_space<vmem>>, %arg6: memref<8x8xf32, #tpu.memory_space<vmem>>) attributes {dimension_semantics = [#tpu.dimension_semantics<parallel>], iteration_bounds = array<i64: 1>, scalar_prefetch = 0 : i64, scratch_operands = 0 : i64, tpu.core_type = #tpu.core_type<tc>, window_params = [{transform_indices = @transform_0, window_bounds = array<i64: 8, 32>}, {pipeline_mode = #tpu.pipeline_mode<synchronous>, transform_indices = @transform_1, window_bounds = array<i64: 32, 128>}, {pipeline_mode = #tpu.pipeline_mode<synchronous>, transform_indices = @transform_2, window_bounds = array<i64: 1, 128>}, {pipeline_mode = #tpu.pipeline_mode<synchronous>, transform_indices = @transform_3, window_bounds = array<i64: 128, 8>}, {pipeline_mode = #tpu.pipeline_mode<synchronous>, transform_indices = @transform_4, window_bounds = array<i64: 1, 8>}, {transform_indices = @transform_5, window_bounds = array<i64: 8, 8>}]} {
    %c0 = arith.constant 0 : index
    %c0_0 = arith.constant 0 : index
    %0 = vector.load %arg1[%c0, %c0_0] : memref<8x32xf32, #tpu.memory_space<vmem>>, vector<8x32xf32>
    %c0_1 = arith.constant 0 : index
    %c0_2 = arith.constant 0 : index
    %1 = vector.load %arg2[%c0_1, %c0_2] : memref<32x128xf32, #tpu.memory_space<vmem>>, vector<32x128xf32>
    %cst = arith.constant dense<0.000000e+00> : vector<8x128xf32>
    %2 = tpu.matmul %0, %1, %cst {dimension_numbers = #tpu.dot_dimension_numbers<[1], [0], [0], [1], [0, 0, 1, 1], [], []>} : vector<8x32xf32>, vector<32x128xf32>, vector<8x128xf32> -> vector<8x128xf32>
    %c0_3 = arith.constant 0 : index
    %c0_4 = arith.constant 0 : index
    %3 = vector.load %arg3[%c0_3, %c0_4] : memref<1x128xf32, #tpu.memory_space<vmem>>, vector<1x128xf32>
    %4 = vector.broadcast %3 : vector<1x128xf32> to vector<8x128xf32>
    %5 = arith.addf %2, %4 : vector<8x128xf32>
    %cst_5 = arith.constant 0.000000e+00 : f32
    %6 = vector.broadcast %cst_5 : f32 to vector<8x128xf32>
    %7 = arith.maximumf %5, %6 : vector<8x128xf32>
    %c0_6 = arith.constant 0 : index
    %c0_7 = arith.constant 0 : index
    %8 = vector.load %arg4[%c0_6, %c0_7] : memref<128x8xf32, #tpu.memory_space<vmem>>, vector<128x8xf32>
    %cst_8 = arith.constant dense<0.000000e+00> : vector<8x8xf32>
    %9 = tpu.matmul %7, %8, %cst_8 {dimension_numbers = #tpu.dot_dimension_numbers<[1], [0], [0], [1], [0, 0, 1, 1], [], []>} : vector<8x128xf32>, vector<128x8xf32>, vector<8x8xf32> -> vector<8x8xf32>
    %c0_9 = arith.constant 0 : index
    %c0_10 = arith.constant 0 : index
    %10 = vector.load %arg5[%c0_9, %c0_10] : memref<1x8xf32, #tpu.memory_space<vmem>>, vector<1x8xf32>
    %11 = vector.broadcast %10 : vector<1x8xf32> to vector<8x8xf32>
    %12 = arith.addf %9, %11 : vector<8x8xf32>
    %c0_11 = arith.constant 0 : index
    %c0_12 = arith.constant 0 : index
    %13 = vector.load %arg6[%c0_11, %c0_12] : memref<8x8xf32, #tpu.memory_space<vmem>>, vector<8x8xf32>
    tpu.vector_store %arg6[%c0_11, %c0_12], %12 {strides = array<i32>} : memref<8x8xf32, #tpu.memory_space<vmem>>, vector<8x8xf32>,
    return
  }
  func.func @transform_0(%arg0: i32) -> (i32, i32) {
    %c0_i32 = arith.constant 0 : i32
    %c0_i32_0 = arith.constant 0 : i32
    return %arg0, %c0_i32 : i32, i32
  }
  func.func @transform_1(%arg0: i32) -> (i32, i32) {
    %c0_i32 = arith.constant 0 : i32
    %c0_i32_0 = arith.constant 0 : i32
    %c0_i32_1 = arith.constant 0 : i32
    return %c0_i32, %c0_i32_0 : i32, i32
  }
  func.func @transform_2(%arg0: i32) -> (i32, i32) {
    %c0_i32 = arith.constant 0 : i32
    %c0_i32_0 = arith.constant 0 : i32
    %c0_i32_1 = arith.constant 0 : i32
    return %c0_i32, %c0_i32_0 : i32, i32
  }
  func.func @transform_3(%arg0: i32) -> (i32, i32) {
    %c0_i32 = arith.constant 0 : i32
    %c0_i32_0 = arith.constant 0 : i32
    %c0_i32_1 = arith.constant 0 : i32
    return %c0_i32, %c0_i32_0 : i32, i32
  }
  func.func @transform_4(%arg0: i32) -> (i32, i32) {
    %c0_i32 = arith.constant 0 : i32
    %c0_i32_0 = arith.constant 0 : i32
    %c0_i32_1 = arith.constant 0 : i32
    return %c0_i32, %c0_i32_0 : i32, i32
  }
  func.func @transform_5(%arg0: i32) -> (i32, i32) {
    %c0_i32 = arith.constant 0 : i32
    %c0_i32_0 = arith.constant 0 : i32
    return %arg0, %c0_i32 : i32, i32
  }
}

</mosaic_0001>

<bundles_post_ra>
// kernel: brain_forward.1
= control target key start
LH: loop header
LB: loop body
LE: loop exit
PB: predicated region body
PF: predicated region fallthrough
CT: control target
= control target key end

     0   :  { %10 = vsyncpa [#allocation3], 0  ;;  %v350_v2 = vmov 0.0|0.0   ;;  %vm351_vm0 = vmmov 0   ;;  %v352_v6 = vmov 0.0   ;;  %vm33_vm1 = vcmask 261120   ;;  %s467_s0 = inlined_call_operand.vmem [shape: f32[4,32], index: 0, kind: input, shape index: {}]   ;;  %s468_s1 = inlined_call_operand.vmem [shape: f32[32,128], index: 1, kind: input, shape index: {}]   ;;  %s469_s2 = inlined_call_operand.vmem [shape: f32[1,128], index: 2, kind: input, shape index: {}]   ;;  %s470_s3 = inlined_call_operand.vmem [shape: f32[128,8], index: 3, kind: input, shape index: {}]   ;;  %s471_s4 = inlined_call_operand.vmem [shape: f32[1,8], index: 4, kind: input, shape index: {}]   ;;  %s472_s5 = inlined_call_operand.hbm [shape: f32[4,8], index: 5, kind: output, shape index: {}]  }
   0x1   :  { %v22_v0 = vld [vmem:[%s468_s1] sm:$0xff]  ;;  %v23_v1 = vld [vmem:[%s468_s1 + $0x8] sm:$0xff]  ;;  %290 = vmatprep.subr.bf16.mxu0 %v350_v2  ;;  %v24_v4 = vld [vmem:[%s468_s1 + $0x10] sm:$0xff]  ;;  %296 = vmatprep.subr.bf16.mxu1 %v350_v2  ;;  %vm201_vm2 = vcmask 64512  }
   0x2   :  { %v291_v3 = vpack.c.bf16 %v23_v1, %v22_v0  ;;  %v25_v5 = vld [vmem:[%s468_s1 + $0x18] sm:$0xff]  ;;  %252 = vmatprep.mubr.msk.f32.mxu0 %vm351_vm0, %v352_v6  ;;  %v108_v7 = vld [vmem:[%s470_s3] sm:$0xff]  ;;  %v109_v8 = vld [vmem:[%s470_s3 + $0x8] sm:$0xff]  ;;  %287 = vmatprep.mubr.msk.f32.mxu1 %vm351_vm0, %v352_v6 }
   0x3   :  { %v110_v9 = vld [vmem:[%s470_s3 + $0x10] sm:$0xff]  ;;  %v294_v10 = vpack.c.bf16 %v25_v5, %v24_v4  ;;  %v297_v11 = vpack.c.bf16 %v109_v8, %v108_v7  ;;  %v111_v12 = vld [vmem:[%s470_s3 + $0x18] sm:$0xff]  ;;  %v112_v14 = vld [vmem:[%s470_s3 + $0x20] sm:$0xff] }
   0x4   :  { %292 = vmatpush3.bf16.msra.mxu0 %v291_v3  ;;  %v300_v13 = vpack.c.bf16 %v111_v12, %v110_v9  ;;  %v113_v15 = vld [vmem:[%s470_s3 + $0x28] sm:$0xff]  ;;  %v21_v16 = vld [vmem:[%s467_s0] sm:$0xff]  ;;  %v114_v18 = vld [vmem:[%s470_s3 + $0x30] sm:$0xff] }
   0x5   :  { %293 = vmatprep.subr.bf16.mxu0 %v350_v2  ;;  %298 = vmatpush3.bf16.msra.mxu1 %v297_v11  ;;  %v303_v17 = vpack.c.bf16 %v113_v15, %v112_v14  ;;  %v115_v19 = vld [vmem:[%s470_s3 + $0x38] sm:$0xff]  ;;  %v116_v21 = vld [vmem:[%s470_s3 + $0x40] sm:$0xff]  ;;  %v117_v22 = vld [vmem:[%s470_s3 + $0x48] sm:$0xff] }
   0x6   :  { %299 = vmatprep.subr.bf16.mxu1 %v350_v2  ;;  %v306_v20 = vpack.c.bf16 %v115_v19, %v114_v18  ;;  %v309_v23 = vpack.c.bf16 %v117_v22, %v116_v21  ;;  %v118_v24 = vld [vmem:[%s470_s3 + $0x50] sm:$0xff]  ;;  %v119_v25 = vld [vmem:[%s470_s3 + $0x58] sm:$0xff]  ;;  %v120_v27 = vld [vmem:[%s470_s3 + $0x60] sm:$0xff] }
   0x7   :  { %v312_v26 = vpack.c.bf16 %v119_v25, %v118_v24  ;;  %v121_v28 = vld [vmem:[%s470_s3 + $0x68] sm:$0xff]  ;;  %v122_v30 = vld [vmem:[%s470_s3 + $0x70] sm:$0xff]  ;;  %v123_v31 = vld [vmem:[%s470_s3 + $0x78] sm:$0xff] }
   0x8   :  { %295 = vmatpush3.bf16.msra.mxu0 %v294_v10  ;;  %v315_v29 = vpack.c.bf16 %v121_v28, %v120_v27  ;;  %v318_v32 = vpack.c.bf16 %v123_v31, %v122_v30  ;;  %v219_v33 = vld [vmem:[%s469_s2] ss:$0 sm:$0xff] }
   0x9   :  { %301 = vmatpush3.bf16.msra.mxu1 %v300_v13  ;;  %v221_v38 = vld [vmem:[%s471_s4] ss:$0 sm:$0xff] }
   0xa   :  { %302 = vmatprep.subr.bf16.mxu1 %v350_v2 }
   0xb   :  { %253 = vmatmul.mubr.msk.f32.vlgmr.msra.gmra.mrb[0].mxu0 %vm33_vm1, %v21_v16 }
   0xd   :  { %304 = vmatpush3.bf16.msra.mxu1 %v303_v17 }
   0xe   :  { %305 = vmatprep.subr.bf16.mxu1 %v350_v2 }
  0x11   :  { %307 = vmatpush3.bf16.msra.mxu1 %v306_v20 }
  0x12   :  { %308 = vmatprep.subr.bf16.mxu1 %v350_v2 }
  0x15   :  { %310 = vmatpush3.bf16.msra.mxu1 %v309_v23 }
  0x16   :  { %311 = vmatprep.subr.bf16.mxu1 %v350_v2 }
  0x19   :  { %313 = vmatpush3.bf16.msra.mxu1 %v312_v26 }
  0x1a   :  { %314 = vmatprep.subr.bf16.mxu1 %v350_v2 }
  0x1d   :  { %316 = vmatpush3.bf16.msra.mxu1 %v315_v29 }
  0x1e   :  { %317 = vmatprep.subr.bf16.mxu1 %v350_v2 }
  0x21   :  { %319 = vmatpush3.bf16.msra.mxu1 %v318_v32 }
  0xde   :  { %v103_v34 = vpop.f32.mrb[0].mxu0 }
  0xdf   :  { %v104_v35 = vadd.f32 %v219_v33, %v103_v34  ;;  %v254_v36 = vpop.f32.mrb[1].mxu0 }
  0xe1   :  { %v107_v37 = vmax.f32 %v104_v35, 0.0 }
  0xe3   :  { %288 = vmatmul.mubr.f32.vlgmr.msra.gmra.mrb[0].mxu1 %v107_v37 }
 0x1b6   :  { %v197_v39 = vpop.f32.mrb[0].mxu1 }
 0x1b7   :  { %v198_v40 = vadd.f32 %v221_v38, %v197_v39  ;;  %v289_v41 = vpop.f32.mrb[1].mxu1 }
 0x1b9   :  { %202 = vst.msk [vmem:[#allocation2] sm:$0xff] %vm201_vm2, %v198_v40 }
 0x1ba   :  { %207 = vsyncadd [#allocation3], 64  ;;  %s353_s3 = smov [#allocation2]  }
 0x1bb   :  { %s208_s11 = sshll.u32 %s353_s3, 4  ;;  %s209_s11 = int_to_ptr.vmem [resolvable:$true] %s208_s11 }
 0x1bc   :  { %s326_s12 = scalar_lea.vmem %s209_s11, 64  ;;  %s330_s2 = scalar_lea.vmem %s209_s11, 128 }
 0x1bd   :  { %p327_p0 = scmp.ne.s32.totalorder %s209_s11, %s326_s12  ;;  %p331_p1 = scmp.lt.s32.totalorder %s209_s11, %s209_s11 }
 0x1be   :  { %p332_p2 = scmp.lt.s32.totalorder %s330_s2, %s326_s12 }
 0x1c0   :  { %p333_p3 = por %p332_p2, %p331_p1 }
 0x1c2   :  { %p334_p4 = pnand %p333_p3, %p327_p0 }
 0x1c4   :  { %337 = shalt.err (!%p334_p4)
}
 0x1c5   :  { %s338_s4 = scalar_lea.hbm %s472_s5, 64 }
 0x1c6   :  { %p339_p5 = scmp.ne.s32.totalorder %s472_s5, %s338_s4  ;;  %p342_p6 = scmp.lt.u32.totalorder %s338_s4, %s472_s5 }
 0x1c8   :  { %p344_p7 = pnand %p342_p6, %p339_p5 }
 0x1ca   :  { %347 = shalt.err (!%p344_p7)
}
 0x1cb   :  { %s354_s19 = smov 64   ;;  %s355_s0 = smov 4  }
 0x1cc   :  { %214 = dma.vmem_to_hbm [thread:$0]  %s209_s11, 64, %s472_s5, [#allocation3], %s354_s19, %s354_s19, %s355_s0  }
 0x1cd   :  { %348 = dma.done.wait [#allocation3], 128  }
 0x1ce   :  { %349 = vsyncadd [#allocation3], 4294967168 }
 0x1cf   :  { %218 = vsyncpa [#allocation3], 1 }

</bundles_post_ra>
